<compile_context>
chip_gen: v6e
topology: v6e:2x2x1
jax: 0.10.0
libtpu: 0.0.40
codegen_flags: <defaults>
</compile_context>

<pallas_src>
import math
import jax
import jax.numpy as jnp
from jax.experimental import pallas as pl
from jax.experimental.pallas import tpu as pltpu  # noqa: F401  (TPU backend)

B = 4            # logical batch (one grid-free invocation)
D = 128          # feature width (lanes)
NL = 4           # number of leaf experts (= len(self.nodes))
NM = 2           # number of mid experts
DOUT = 128       # output width of `end`
GPAD = 128       # gate logits padded to a full lane tile


# ----------------------------- kernel ---------------------------------------

def fused_tree_kernel(x_ref, wg_ref, bg_ref,
                      wlcat_ref, blcat_ref, wmcat_ref, bmcat_ref,
                      wr_ref, br_ref, we_ref, be_ref,
                      out_ref, idx_ref):
    x_f32 = x_ref[...]                                                # (B, D) f32
    x = x_f32.astype(jnp.bfloat16)                                    # MXU operand

    # ---- gate in f32 (routing parity with the fp32 PyTorch gate).
    # Padded lanes carry bias -1e30 so they never win the argmax.
    logits = (jnp.dot(x_f32, wg_ref[...], preferred_element_type=jnp.float32)
              + bg_ref[...])                                          # (B, GPAD) f32

    # ---- first-max argmax (matches torch.max(...).indices tie-break).
    lane = jax.lax.broadcasted_iota(jnp.int32, logits.shape, 1).astype(jnp.float32)
    row_max = jnp.max(logits, axis=-1, keepdims=True)                 # (B, 1)
    leaf_f = jnp.min(jnp.where(logits == row_max, lane, float(GPAD)),
                     axis=-1, keepdims=True)                          # (B, 1) in [0, NL)
    idx_ref[...] = leaf_f.astype(jnp.int32)                           # small int32 output

    leaf_b = jnp.broadcast_to(leaf_f, (B, D))                         # hoisted broadcasts
    mid_b = jnp.floor(leaf_b * 0.5)                                   # leaf's parent id

    # ---- leaf layer: ONE fused (B,128)x(128,512) dot, then per-sample select.
    hcat = jnp.maximum(
        jnp.dot(x, wlcat_ref[...], preferred_element_type=jnp.float32)
        + blcat_ref[...], 0.0)                                        # (B, NL*D) f32
    h = jnp.zeros((B, D), jnp.float32)
    for l in range(NL):                                               # lane-aligned slabs
        h = jnp.where(leaf_b == float(l), hcat[:, l * D:(l + 1) * D], h)
    h = h.astype(jnp.bfloat16)

    # ---- mid layer: ONE fused (B,128)x(128,256) dot, then select.
    h2cat = jnp.maximum(
        jnp.dot(h, wmcat_ref[...], preferred_element_type=jnp.float32)
        + bmcat_ref[...], 0.0)                                        # (B, NM*D) f32
    h2 = jnp.where(mid_b == 0.0, h2cat[:, :D], h2cat[:, D:2 * D]).astype(jnp.bfloat16)

    # ---- root (shared).
    h3 = jnp.maximum(
        jnp.dot(h2, wr_ref[...], preferred_element_type=jnp.float32) + br_ref[...],
        0.0).astype(jnp.bfloat16)

    # ---- end module (plain Linear, no ReLU).
    out_ref[...] = (
        jnp.dot(h3, we_ref[...], preferred_element_type=jnp.float32) + be_ref[...]
    ).astype(out_ref.dtype)


# ----------------------------- wrapper ---------------------------------------

@jax.jit
def tree_model_forward(x, gate_params, tree_params):
    """The whole jitted forward is a single pallas_call (no surrounding XLA ops)."""
    wg_pad, bg_pad = gate_params
    (w_leaf_cat, b_leaf_cat, w_mid_cat, b_mid_cat,
     w_root, b_root, w_end, b_end) = tree_params

    out, leaf_idx = pl.pallas_call(
        fused_tree_kernel,
        # No grid: single invocation; default full-array BlockSpecs keep every
        # operand (x + ~0.3 MB of weights) fully VMEM-resident.
        out_shape=(jax.ShapeDtypeStruct((B, DOUT), jnp.float32),
                   jax.ShapeDtypeStruct((B, 1), jnp.int32)),
    )(x, wg_pad, bg_pad,
      w_leaf_cat, b_leaf_cat, w_mid_cat, b_mid_cat,
      w_root, b_root, w_end, b_end)
    return out, leaf_idx


# ----------------------------- params / reference ----------------------------

def init_linear(key, fan_in, fan_out):
    k1, k2 = jax.random.split(key)
    bound = 1.0 / math.sqrt(fan_in)
    w = jax.random.uniform(k1, (fan_in, fan_out), jnp.float32, -bound, bound)
    b = jax.random.uniform(k2, (1, fan_out), jnp.float32, -bound, bound)
    return w, b


def reference_forward(x, leaf_idx, raw_params):
    """Pure-JAX reference mirroring the kernel's bf16-input / f32-accum math."""
    (leaf, mid, (w_root, b_root), (w_end, b_end)) = raw_params
    outs = []
    for i in range(B):
        g = int(leaf_idx[i])
        xb = x[i:i + 1].astype(jnp.bfloat16)
        wl, bl = leaf[g]
        h = jnp.maximum(
            jnp.dot(xb, wl.astype(jnp.bfloat16), preferred_element_type=jnp.float32)
            + bl, 0.0).astype(jnp.bfloat16)
        wm, bm = mid[g // 2]
        h = jnp.maximum(
            jnp.dot(h, wm.astype(jnp.bfloat16), preferred_element_type=jnp.float32)
            + bm, 0.0).astype(jnp.bfloat16)
        h = jnp.maximum(
            jnp.dot(h, w_root.astype(jnp.bfloat16), preferred_element_type=jnp.float32)
            + b_root, 0.0).astype(jnp.bfloat16)
        outs.append(
            jnp.dot(h, w_end.astype(jnp.bfloat16), preferred_element_type=jnp.float32)
            + b_end)
    return jnp.concatenate(outs, axis=0)


# ----------------------------- main ------------------------------------------

if __name__ == "__main__":
    key = jax.random.PRNGKey(0)
    keys = jax.random.split(key, 12)

    # 4 leaf nodes, 2 mid nodes, 1 root -- each with its own Linear(D, D).
    leaf = [init_linear(keys[i], D, D) for i in range(NL)]
    mid = [init_linear(keys[NL + i], D, D) for i in range(NM)]
    w_root, b_root = init_linear(keys[6], D, D)
    w_end, b_end = init_linear(keys[7], D, DOUT)
    w_gate, b_gate = init_linear(keys[8], D, NL)

    # Kernel-side packing (done once, outside the jitted forward):
    #   leaf / mid expert weights concatenated along N for a single fused dot.
    w_leaf_cat = jnp.concatenate([w for w, _ in leaf], axis=1).astype(jnp.bfloat16)  # (D, 512)
    b_leaf_cat = jnp.concatenate([b for _, b in leaf], axis=1)                       # (1, 512) f32
    w_mid_cat = jnp.concatenate([w for w, _ in mid], axis=1).astype(jnp.bfloat16)    # (D, 256)
    b_mid_cat = jnp.concatenate([b for _, b in mid], axis=1)                         # (1, 256) f32
    w_root_b = w_root.astype(jnp.bfloat16)                                           # (D, D)
    w_end_b = w_end.astype(jnp.bfloat16)                                             # (D, DOUT)
    # Gate kept in f32 (routing parity); output lanes padded 4 -> 128 with zero
    # weights and -1e30 bias so the logits tensor is lane-dense.
    wg_pad = jnp.zeros((D, GPAD), jnp.float32).at[:, :NL].set(w_gate)
    bg_pad = jnp.full((1, GPAD), -1e30, jnp.float32).at[:, :NL].set(b_gate)

    gate_params = (wg_pad, bg_pad)
    tree_params = (w_leaf_cat, b_leaf_cat, w_mid_cat, b_mid_cat,
                   w_root_b, b_root, w_end_b, b_end)
    raw_params = (leaf, mid, (w_root, b_root), (w_end, b_end))

    x = jax.random.normal(keys[9], (B, D), jnp.float32)

    out, leaf_idx = tree_model_forward(x, gate_params, tree_params)
    out = jax.block_until_ready(out)
    leaf_idx_host = jax.device_get(leaf_idx)[:, 0]

    assert out.shape == (B, DOUT) and out.dtype == jnp.float32
    assert leaf_idx.shape == (B, 1) and leaf_idx.dtype == jnp.int32
    assert all(0 <= int(g) < NL for g in leaf_idx_host), "gate produced invalid leaf index"

    ref = reference_forward(x, leaf_idx_host, raw_params)
    assert jnp.allclose(out, ref, atol=5e-3, rtol=5e-3), "mismatch vs JAX reference"

    print("KERNEL_OK")
</pallas_src>

<mosaic_0001>
module attributes {stable_mosaic.version = 11 : i64} {
  func.func @fused_tree_kernel(%arg0: memref<4x128xf32, #tpu.memory_space<vmem>>, %arg1: memref<128x128xf32, #tpu.memory_space<vmem>>, %arg2: memref<1x128xf32, #tpu.memory_space<vmem>>, %arg3: memref<128x512xbf16, #tpu.memory_space<vmem>>, %arg4: memref<1x512xf32, #tpu.memory_space<vmem>>, %arg5: memref<128x256xbf16, #tpu.memory_space<vmem>>, %arg6: memref<1x256xf32, #tpu.memory_space<vmem>>, %arg7: memref<128x128xbf16, #tpu.memory_space<vmem>>, %arg8: memref<1x128xf32, #tpu.memory_space<vmem>>, %arg9: memref<128x128xbf16, #tpu.memory_space<vmem>>, %arg10: memref<1x128xf32, #tpu.memory_space<vmem>>, %arg11: memref<4x128xf32, #tpu.memory_space<vmem>>, %arg12: memref<4x1xi32, #tpu.memory_space<vmem>>) attributes {dimension_semantics = [], scalar_prefetch = 0 : i64, scratch_operands = 0 : i64, tpu.core_type = #tpu.core_type<tc>} {
    %c0 = arith.constant 0 : index
    %c0_0 = arith.constant 0 : index
    %0 = vector.load %arg0[%c0, %c0_0] : memref<4x128xf32, #tpu.memory_space<vmem>>, vector<4x128xf32>
    %1 = arith.truncf %0 : vector<4x128xf32> to vector<4x128xbf16>
    %c0_1 = arith.constant 0 : index
    %c0_2 = arith.constant 0 : index
    %2 = vector.load %arg1[%c0_1, %c0_2] : memref<128x128xf32, #tpu.memory_space<vmem>>, vector<128x128xf32>
    %cst = arith.constant dense<0.000000e+00> : vector<4x128xf32>
    %3 = tpu.matmul %0, %2, %cst {dimension_numbers = #tpu.dot_dimension_numbers<[1], [0], [0], [1], [0, 0, 1, 1], [], []>} : vector<4x128xf32>, vector<128x128xf32>, vector<4x128xf32> -> vector<4x128xf32>
    %c0_3 = arith.constant 0 : index
    %c0_4 = arith.constant 0 : index
    %4 = vector.load %arg2[%c0_3, %c0_4] : memref<1x128xf32, #tpu.memory_space<vmem>>, vector<1x128xf32>
    %5 = vector.broadcast %4 : vector<1x128xf32> to vector<4x128xf32>
    %6 = arith.addf %3, %5 : vector<4x128xf32>
    %7 = tpu.iota {dimensions = array<i32: 1>} : vector<4x128xi32>
    %8 = arith.sitofp %7 : vector<4x128xi32> to vector<4x128xf32>
    %cst_5 = arith.constant dense<0xFF800000> : vector<4xf32>
    %9 = vector.multi_reduction <maximumf>, %6, %cst_5 [1] : vector<4x128xf32> to vector<4xf32>
    %10 = vector.shape_cast %9 : vector<4xf32> to vector<4x1xf32>
    %11 = vector.broadcast %10 : vector<4x1xf32> to vector<4x128xf32>
    %12 = arith.cmpf oeq, %6, %11 : vector<4x128xf32>
    %cst_6 = arith.constant 1.280000e+02 : f32
    %13 = vector.broadcast %cst_6 : f32 to vector<4x128xf32>
    %14 = arith.select %12, %8, %13 : vector<4x128xi1>, vector<4x128xf32>
    %cst_7 = arith.constant dense<0x7F800000> : vector<4xf32>
    %15 = vector.multi_reduction <minimumf>, %14, %cst_7 [1] : vector<4x128xf32> to vector<4xf32>
    %16 = vector.shape_cast %15 : vector<4xf32> to vector<4x1xf32>
    %17 = arith.fptosi %16 : vector<4x1xf32> to vector<4x1xi32>
    %c0_8 = arith.constant 0 : index
    %c0_9 = arith.constant 0 : index
    %18 = vector.load %arg12[%c0_8, %c0_9] : memref<4x1xi32, #tpu.memory_space<vmem>>, vector<4x1xi32>
    tpu.vector_store %arg12[%c0_8, %c0_9], %17 {strides = array<i32>} : memref<4x1xi32, #tpu.memory_space<vmem>>, vector<4x1xi32>,
    %19 = vector.shape_cast %16 : vector<4x1xf32> to vector<4x1xf32>
    %20 = vector.broadcast %19 : vector<4x1xf32> to vector<4x128xf32>
    %cst_10 = arith.constant 5.000000e-01 : f32
    %21 = vector.broadcast %cst_10 : f32 to vector<4x128xf32>
    %22 = arith.mulf %20, %21 : vector<4x128xf32>
    %23 = math.floor %22 : vector<4x128xf32>
    %c0_11 = arith.constant 0 : index
    %c0_12 = arith.constant 0 : index
    %24 = vector.load %arg3[%c0_11, %c0_12] : memref<128x512xbf16, #tpu.memory_space<vmem>>, vector<128x512xbf16>
    %cst_13 = arith.constant dense<0.000000e+00> : vector<4x512xf32>
    %25 = tpu.matmul %1, %24, %cst_13 {dimension_numbers = #tpu.dot_dimension_numbers<[1], [0], [0], [1], [0, 0, 1, 1], [], []>} : vector<4x128xbf16>, vector<128x512xbf16>, vector<4x512xf32> -> vector<4x512xf32>
    %c0_14 = arith.constant 0 : index
    %c0_15 = arith.constant 0 : index
    %26 = vector.load %arg4[%c0_14, %c0_15] : memref<1x512xf32, #tpu.memory_space<vmem>>, vector<1x512xf32>
    %27 = vector.broadcast %26 : vector<1x512xf32> to vector<4x512xf32>
    %28 = arith.addf %25, %27 : vector<4x512xf32>
    %cst_16 = arith.constant 0.000000e+00 : f32
    %29 = vector.broadcast %cst_16 : f32 to vector<4x512xf32>
    %30 = arith.maximumf %28, %29 : vector<4x512xf32>
    %cst_17 = arith.constant 0.000000e+00 : f32
    %31 = vector.broadcast %cst_17 : f32 to vector<4x128xf32>
    %cst_18 = arith.constant 0.000000e+00 : f32
    %32 = vector.broadcast %cst_18 : f32 to vector<4x128xf32>
    %33 = arith.cmpf oeq, %20, %32 : vector<4x128xf32>
    %34 = vector.extract_strided_slice %30 {offsets = [0, 0], sizes = [4, 128], strides = [1, 1]} : vector<4x512xf32> to vector<4x128xf32>
    %35 = arith.select %33, %34, %31 : vector<4x128xi1>, vector<4x128xf32>
    %cst_19 = arith.constant 1.000000e+00 : f32
    %36 = vector.broadcast %cst_19 : f32 to vector<4x128xf32>
    %37 = arith.cmpf oeq, %20, %36 : vector<4x128xf32>
    %38 = vector.extract_strided_slice %30 {offsets = [0, 128], sizes = [4, 128], strides = [1, 1]} : vector<4x512xf32> to vector<4x128xf32>
    %39 = arith.select %37, %38, %35 : vector<4x128xi1>, vector<4x128xf32>
    %cst_20 = arith.constant 2.000000e+00 : f32
    %40 = vector.broadcast %cst_20 : f32 to vector<4x128xf32>
    %41 = arith.cmpf oeq, %20, %40 : vector<4x128xf32>
    %42 = vector.extract_strided_slice %30 {offsets = [0, 256], sizes = [4, 128], strides = [1, 1]} : vector<4x512xf32> to vector<4x128xf32>
    %43 = arith.select %41, %42, %39 : vector<4x128xi1>, vector<4x128xf32>
    %cst_21 = arith.constant 3.000000e+00 : f32
    %44 = vector.broadcast %cst_21 : f32 to vector<4x128xf32>
    %45 = arith.cmpf oeq, %20, %44 : vector<4x128xf32>
    %46 = vector.extract_strided_slice %30 {offsets = [0, 384], sizes = [4, 128], strides = [1, 1]} : vector<4x512xf32> to vector<4x128xf32>
    %47 = arith.select %45, %46, %43 : vector<4x128xi1>, vector<4x128xf32>
    %48 = arith.truncf %47 : vector<4x128xf32> to vector<4x128xbf16>
    %c0_22 = arith.constant 0 : index
    %c0_23 = arith.constant 0 : index
    %49 = vector.load %arg5[%c0_22, %c0_23] : memref<128x256xbf16, #tpu.memory_space<vmem>>, vector<128x256xbf16>
    %cst_24 = arith.constant dense<0.000000e+00> : vector<4x256xf32>
    %50 = tpu.matmul %48, %49, %cst_24 {dimension_numbers = #tpu.dot_dimension_numbers<[1], [0], [0], [1], [0, 0, 1, 1], [], []>} : vector<4x128xbf16>, vector<128x256xbf16>, vector<4x256xf32> -> vector<4x256xf32>
    %c0_25 = arith.constant 0 : index
    %c0_26 = arith.constant 0 : index
    %51 = vector.load %arg6[%c0_25, %c0_26] : memref<1x256xf32, #tpu.memory_space<vmem>>, vector<1x256xf32>
    %52 = vector.broadcast %51 : vector<1x256xf32> to vector<4x256xf32>
    %53 = arith.addf %50, %52 : vector<4x256xf32>
    %cst_27 = arith.constant 0.000000e+00 : f32
    %54 = vector.broadcast %cst_27 : f32 to vector<4x256xf32>
    %55 = arith.maximumf %53, %54 : vector<4x256xf32>
    %cst_28 = arith.constant 0.000000e+00 : f32
    %56 = vector.broadcast %cst_28 : f32 to vector<4x128xf32>
    %57 = arith.cmpf oeq, %23, %56 : vector<4x128xf32>
    %58 = vector.extract_strided_slice %55 {offsets = [0, 0], sizes = [4, 128], strides = [1, 1]} : vector<4x256xf32> to vector<4x128xf32>
    %59 = vector.extract_strided_slice %55 {offsets = [0, 128], sizes = [4, 128], strides = [1, 1]} : vector<4x256xf32> to vector<4x128xf32>
    %60 = arith.select %57, %58, %59 : vector<4x128xi1>, vector<4x128xf32>
    %61 = arith.truncf %60 : vector<4x128xf32> to vector<4x128xbf16>
    %c0_29 = arith.constant 0 : index
    %c0_30 = arith.constant 0 : index
    %62 = vector.load %arg7[%c0_29, %c0_30] : memref<128x128xbf16, #tpu.memory_space<vmem>>, vector<128x128xbf16>
    %cst_31 = arith.constant dense<0.000000e+00> : vector<4x128xf32>
    %63 = tpu.matmul %61, %62, %cst_31 {dimension_numbers = #tpu.dot_dimension_numbers<[1], [0], [0], [1], [0, 0, 1, 1], [], []>} : vector<4x128xbf16>, vector<128x128xbf16>, vector<4x128xf32> -> vector<4x128xf32>
    %c0_32 = arith.constant 0 : index
    %c0_33 = arith.constant 0 : index
    %64 = vector.load %arg8[%c0_32, %c0_33] : memref<1x128xf32, #tpu.memory_space<vmem>>, vector<1x128xf32>
    %65 = vector.broadcast %64 : vector<1x128xf32> to vector<4x128xf32>
    %66 = arith.addf %63, %65 : vector<4x128xf32>
    %cst_34 = arith.constant 0.000000e+00 : f32
    %67 = vector.broadcast %cst_34 : f32 to vector<4x128xf32>
    %68 = arith.maximumf %66, %67 : vector<4x128xf32>
    %69 = arith.truncf %68 : vector<4x128xf32> to vector<4x128xbf16>
    %c0_35 = arith.constant 0 : index
    %c0_36 = arith.constant 0 : index
    %70 = vector.load %arg9[%c0_35, %c0_36] : memref<128x128xbf16, #tpu.memory_space<vmem>>, vector<128x128xbf16>
    %cst_37 = arith.constant dense<0.000000e+00> : vector<4x128xf32>
    %71 = tpu.matmul %69, %70, %cst_37 {dimension_numbers = #tpu.dot_dimension_numbers<[1], [0], [0], [1], [0, 0, 1, 1], [], []>} : vector<4x128xbf16>, vector<128x128xbf16>, vector<4x128xf32> -> vector<4x128xf32>
    %c0_38 = arith.constant 0 : index
    %c0_39 = arith.constant 0 : index
    %72 = vector.load %arg10[%c0_38, %c0_39] : memref<1x128xf32, #tpu.memory_space<vmem>>, vector<1x128xf32>
    %73 = vector.broadcast %72 : vector<1x128xf32> to vector<4x128xf32>
    %74 = arith.addf %71, %73 : vector<4x128xf32>
    %c0_40 = arith.constant 0 : index
    %c0_41 = arith.constant 0 : index
    %75 = vector.load %arg11[%c0_40, %c0_41] : memref<4x128xf32, #tpu.memory_space<vmem>>, vector<4x128xf32>
    tpu.vector_store %arg11[%c0_40, %c0_41], %74 {strides = array<i32>} : memref<4x128xf32, #tpu.memory_space<vmem>>, vector<4x128xf32>,
    return
  }
}

</mosaic_0001>

<bundles_post_ra>
// kernel: tree_model_forward.1
= control target key start
LH: loop header
LB: loop body
LE: loop exit
PB: predicated region body
PF: predicated region fallthrough
CT: control target
= control target key end

     0   :  { %18 = vsyncpa [#allocation3], 0  ;;  %s1551_s0 = inlined_call_operand.hbm [shape: f32[4,128], index: 0, kind: input, shape index: {}]   ;;  %s1552_s1 = inlined_call_operand.hbm [shape: f32[128,128], index: 1, kind: input, shape index: {}]   ;;  %s1553_s2 = inlined_call_operand.vmem [shape: f32[1,128], index: 2, kind: input, shape index: {}]   ;;  %s1554_s3 = inlined_call_operand.hbm [shape: bf16[128,512], index: 3, kind: input, shape index: {}]   ;;  %s1555_s4 = inlined_call_operand.vmem [shape: f32[1,512], index: 4, kind: input, shape index: {}]   ;;  %s1556_s5 = inlined_call_operand.hbm [shape: bf16[128,256], index: 5, kind: input, shape index: {}]   ;;  %s1557_s6 = inlined_call_operand.vmem [shape: f32[1,256], index: 6, kind: input, shape index: {}]   ;;  %s1558_s7 = inlined_call_operand.hbm [shape: bf16[128,128], index: 7, kind: input, shape index: {}]   ;;  %s1559_s8 = inlined_call_operand.vmem [shape: f32[1,128], index: 8, kind: input, shape index: {}]   ;;  %s1560_s9 = inlined_call_operand.hbm [shape: bf16[128,128], index: 9, kind: input, shape index: {}]   ;;  %s1561_s10 = inlined_call_operand.vmem [shape: f32[1,128], index: 10, kind: input, shape index: {}]   ;;  %s1562_s11 = inlined_call_operand.hbm [shape: f32[4,128], index: 11, kind: output, shape index: {0}]   ;;  %s1563_s12 = inlined_call_operand.vmem [shape: s32[4,1], index: 12, kind: output, shape index: {1}]  }
   0x1   :  { %19 = vsyncpa [#allocation6], 0 }
   0x2   :  { %20 = vsyncpa [#allocation9], 0 }
   0x3   :  { %21 = vsyncpa [#allocation12], 0 }
   0x4   :  { %22 = vsyncpa [#allocation4], 0  ;;  %s1377_s21 = smov [#allocation5]  }
   0x5   :  { %s38_s22 = sshll.u32 %s1377_s21, 4  ;;  %s39_s22 = int_to_ptr.vmem [resolvable:$true] %s38_s22 }
   0x6   :  { %s1235_s23 = scalar_lea.vmem %s39_s22, 2048  ;;  %p1240_p1 = scmp.lt.s32.totalorder %s39_s22, %s39_s22 }
   0x7   :  { %p1236_p0 = scmp.ne.s32.totalorder %s39_s22, %s1235_s23  ;;  %p1241_p2 = scmp.lt.s32.totalorder %s1235_s23, %s1235_s23 }
   0x9   :  { %p1242_p3 = por %p1241_p2, %p1240_p1 }
   0xb   :  { %p1243_p4 = pnand %p1242_p3, %p1236_p0 }
   0xd   :  { %1246 = shalt.err (!%p1243_p4)
}
   0xe   :  { %s1378_s24 = smov 128   ;;  %s1379_s25 = smov 8  }
   0xf   :  { %44 = dma.hbm_to_vmem [thread:$0]  %s1552_s1, 2048, %s39_s22, [#allocation6], %s1378_s24, %s1378_s24, %s1379_s25  }
  0x10   :  { %s1380_s28 = smov [#allocation8]   ;;  %s1381_s30 = smov [#allocation2]  }
  0x11   :  { %s66_s29 = sshll.u32 %s1380_s28, 4  ;;  %s29_s13 = sshll.u32 %s1381_s30, 4  ;;  %s67_s29 = int_to_ptr.vmem [resolvable:$true] %s66_s29  ;;  %s30_s13 = int_to_ptr.vmem [resolvable:$true] %s29_s13 }
  0x12   :  { %s1255_s14 = scalar_lea.vmem %s67_s29, 2048  ;;  %p1260_p6 = scmp.lt.s32.totalorder %s67_s29, %s67_s29 }
  0x13   :  { %p1256_p5 = scmp.ne.s32.totalorder %s67_s29, %s1255_s14  ;;  %p1261_p7 = scmp.lt.s32.totalorder %s1255_s14, %s1255_s14 }
  0x15   :  { %p1262_p8 = por %p1261_p7, %p1260_p6 }
  0x17   :  { %p1263_p9 = pnand %p1262_p8, %p1256_p5 }
  0x19   :  { %1266 = shalt.err (!%p1263_p9)
}
  0x1a   :  { %72 = dma.hbm_to_vmem [thread:$0]  %s1556_s5, 2048, %s67_s29, [#allocation9], %s1378_s24, %s1378_s24, %s1379_s25  }
  0x1b   :  { %s1275_s17 = scalar_lea.vmem %s30_s13, 64  ;;  %p1280_p11 = scmp.lt.s32.totalorder %s30_s13, %s30_s13 }
  0x1c   :  { %p1276_p10 = scmp.ne.s32.totalorder %s30_s13, %s1275_s17  ;;  %p1281_p12 = scmp.lt.s32.totalorder %s1275_s17, %s1275_s17 }
  0x1e   :  { %p1282_p13 = por %p1281_p12, %p1280_p11 }
  0x20   :  { %p1283_p0 = pnand %p1282_p13, %p1276_p10 }
  0x22   :  { %1286 = shalt.err (!%p1283_p0)
}
  0x23   :  { %32 = dma.hbm_to_vmem [thread:$0]  %s1551_s0, 64, %s30_s13, [#allocation3]  }
  0x24   :  { %s1382_s19 = smov [#allocation7]  }
  0x25   :  { %s52_s20 = sshll.u32 %s1382_s19, 4  ;;  %s53_s20 = int_to_ptr.vmem [resolvable:$true] %s52_s20 }
  0x26   :  { %s1295_s21 = scalar_lea.vmem %s53_s20, 4096  ;;  %p1300_p2 = scmp.lt.s32.totalorder %s53_s20, %s53_s20 }
  0x27   :  { %p1296_p1 = scmp.ne.s32.totalorder %s53_s20, %s1295_s21  ;;  %p1301_p3 = scmp.lt.s32.totalorder %s1295_s21, %s1295_s21 }
  0x29   :  { %p1302_p4 = por %p1301_p3, %p1300_p2 }
  0x2b   :  { %p1303_p5 = pnand %p1302_p4, %p1296_p1 }
  0x2d   :  { %1306 = shalt.err (!%p1303_p5)
}
  0x2e   :  { %s1383_s5 = smov 256   ;;  %s1384_s22 = smov 16  }
  0x2f   :  { %58 = dma.hbm_to_vmem [thread:$0]  %s1554_s3, 4096, %s53_s20, [#allocation6], %s1383_s5, %s1383_s5, %s1384_s22  }
  0x30   :  { %s1385_s25 = smov [#allocation10]  }
  0x31   :  { %s80_s26 = sshll.u32 %s1385_s25, 4  ;;  %s81_s26 = int_to_ptr.vmem [resolvable:$true] %s80_s26 }
  0x32   :  { %s1315_s0 = scalar_lea.vmem %s81_s26, 1024  ;;  %p1320_p7 = scmp.lt.s32.totalorder %s81_s26, %s81_s26 }
  0x33   :  { %p1316_p6 = scmp.ne.s32.totalorder %s81_s26, %s1315_s0  ;;  %p1321_p8 = scmp.lt.s32.totalorder %s1315_s0, %s1315_s0 }
  0x35   :  { %p1322_p9 = por %p1321_p8, %p1320_p7 }
  0x37   :  { %p1323_p10 = pnand %p1322_p9, %p1316_p6 }
  0x39   :  { %1326 = shalt.err (!%p1323_p10)
}
  0x3a   :  { %s1386_s27 = smov 64   ;;  %s1387_s28 = smov 4  }
  0x3b   :  { %86 = dma.hbm_to_vmem [thread:$0]  %s1558_s7, 1024, %s81_s26, [#allocation9], %s1386_s27, %s1386_s27, %s1387_s28  }
  0x3c   :  { %s1388_s13 = smov [#allocation11]  }
  0x3d   :  { %s94_s14 = sshll.u32 %s1388_s13, 4  ;;  %s95_s14 = int_to_ptr.vmem [resolvable:$true] %s94_s14 }
  0x3e   :  { %s1335_s3 = scalar_lea.vmem %s95_s14, 1024  ;;  %p1340_p12 = scmp.lt.s32.totalorder %s95_s14, %s95_s14 }
  0x3f   :  { %p1336_p11 = scmp.ne.s32.totalorder %s95_s14, %s1335_s3  ;;  %p1341_p13 = scmp.lt.s32.totalorder %s1335_s3, %s1335_s3 }
  0x41   :  { %p1342_p0 = por %p1341_p13, %p1340_p12 }
  0x43   :  { %p1343_p1 = pnand %p1342_p0, %p1336_p11 }
  0x45   :  { %1346 = shalt.err (!%p1343_p1)
}
  0x46   :  { %100 = dma.hbm_to_vmem [thread:$0]  %s1560_s9, 1024, %s95_s14, [#allocation12], %s1386_s27, %s1386_s27, %s1387_s28  }
  0x47   :  { %1367 = dma.done.wait [#allocation3], 64  }
  0x48   :  { %1368 = vsyncadd [#allocation3], 4294967232 }
  0x49   :  { %1369 = dma.done.wait [#allocation6], 6144  }
  0x4a   :  { %1370 = vsyncadd [#allocation6], 4294961152 }
  0x4b   :  { %1371 = dma.done.wait [#allocation9], 3072  }
  0x4c   :  { %1372 = vsyncadd [#allocation9], 4294964224 }
  0x4d   :  { %1373 = dma.done.wait [#allocation12], 1024  }
  0x4e   :  { %1374 = vsyncadd [#allocation12], 4294966272  ;;  %v1389_v0 = vmov 0.0   ;;  %vm1390_vm0 = vmmov 0   ;;  %v139_v1 = vld [vmem:[#allocation5 + $0x78] sm:$0xff]  ;;  %v138_v2 = vld [vmem:[#allocation5 + $0x70] sm:$0xff] }
  0x4f   :  { %1046 = vmatprep.subr.mxu0 %v1389_v0  ;;  %1078 = vmatprep.mubr.msk.f32.mxu0 %vm1390_vm0, %v1389_v0  ;;  %v137_v3 = vld [vmem:[#allocation5 + $0x68] sm:$0xff]  ;;  %v136_v4 = vld [vmem:[#allocation5 + $0x60] sm:$0xff]  ;;  %v135_v5 = vld [vmem:[#allocation5 + $0x58] sm:$0xff]  ;;  %v1391_v33 = vmov 0   ;;  %vm220_vm1 = vcmask 1043456   ;;  %vm230_vm5 = vcmask 3072  }
  0x50   :  { %1047 = vmatpush3.msra.mxu0 %v139_v1  ;;  %v134_v6 = vld [vmem:[#allocation5 + $0x50] sm:$0xff]  ;;  %v133_v7 = vld [vmem:[#allocation5 + $0x48] sm:$0xff]  ;;  %v132_v8 = vld [vmem:[#allocation5 + $0x40] sm:$0xff]  ;;  %480 = vmatprep.mubr.bf16.mxu1 %v1391_v33  ;;  %s1392_s5 = smov [#allocation13]  }
  0x51   :  { %1048 = vmatprep.subr.mxu0 %v1389_v0  ;;  %v131_v9 = vld [vmem:[#allocation5 + $0x38] sm:$0xff]  ;;  %v130_v10 = vld [vmem:[#allocation5 + $0x30] sm:$0xff]  ;;  %v129_v11 = vld [vmem:[#allocation5 + $0x28] sm:$0xff]  ;;  %s928_s22 = sshll.u32 %s1392_s5, 4  ;;  %s929_s22 = int_to_ptr.vmem [resolvable:$true] %s928_s22 }
  0x52   :  { %1049 = vmatpush3.msra.mxu0 %v138_v2  ;;  %v128_v12 = vld [vmem:[#allocation5 + $0x20] sm:$0xff]  ;;  %v127_v13 = vld [vmem:[#allocation5 + $0x18] sm:$0xff]  ;;  %v126_v14 = vld [vmem:[#allocation5 + $0x10] sm:$0xff]  ;;  %p1352_p3 = scmp.lt.s32.totalorder %s929_s22, %s929_s22 }
  0x53   :  { %1050 = vmatprep.subr.mxu0 %v1389_v0  ;;  %v125_v15 = vld [vmem:[#allocation5 + $0x8] sm:$0xff]  ;;  %v124_v16 = vld [vmem:[#allocation5] sm:$0xff]  ;;  %v1492_v17 = vld [vmem:[#allocation2] sm:$0xf] }
  0x54   :  { %1051 = vmatpush3.msra.mxu0 %v137_v3  ;;  %v1139_v18 = vld [vmem:[#allocation7 + $0xe4] ss:$16 sps:$4 sm:$0xff]   ;;  %v1141_v19 = vld [vmem:[#allocation7 + $0xe0] ss:$16 sps:$4 sm:$0xff]   ;;  %v1142_v20 = vld [vmem:[#allocation7 + $0xe8] ss:$16 sps:$4 sm:$0xff]   ;;  %v123_v51 = vpack.c.bf16 %v1492_v17, %v1492_v17 }
  0x55   :  { %1052 = vmatprep.subr.mxu0 %v1389_v0  ;;  %v1144_v21 = vld [vmem:[#allocation7 + $0xec] ss:$16 sps:$4 sm:$0xff]   ;;  %v1145_v22 = vld [vmem:[#allocation7 + $0xc4] ss:$16 sps:$4 sm:$0xff]   ;;  %448 = vmatprep.subr.bf16.mxu1 %v1139_v18  ;;  %v1147_v24 = vld [vmem:[#allocation7 + $0xc0] ss:$16 sps:$4 sm:$0xff]  }
  0x56   :  { %1053 = vmatpush3.msra.mxu0 %v136_v4  ;;  %v1150_v23 = vld [vmem:[#allocation7 + $0xcc] ss:$16 sps:$4 sm:$0xff]   ;;  %449 = vmatpush1.bf16.msra.mxu1 %v1141_v19  ;;  %v1148_v25 = vld [vmem:[#allocation7 + $0xc8] ss:$16 sps:$4 sm:$0xff]   ;;  %v1151_v26 = vld [vmem:[#allocation7 + $0xa4] ss:$16 sps:$4 sm:$0xff]  }
  0x57   :  { %1054 = vmatprep.subr.mxu0 %v1389_v0  ;;  %450 = vmatprep.subr.bf16.mxu1 %v1145_v22  ;;  %v1156_v27 = vld [vmem:[#allocation7 + $0xac] ss:$16 sps:$4 sm:$0xff]   ;;  %v1153_v28 = vld [vmem:[#allocation7 + $0xa0] ss:$16 sps:$4 sm:$0xff]   ;;  %v1154_v29 = vld [vmem:[#allocation7 + $0xa8] ss:$16 sps:$4 sm:$0xff]  }
  0x58   :  { %1055 = vmatpush3.msra.mxu0 %v135_v5  ;;  %v1157_v30 = vld [vmem:[#allocation7 + $0x84] ss:$16 sps:$4 sm:$0xff]   ;;  %v1162_v31 = vld [vmem:[#allocation7 + $0x8c] ss:$16 sps:$4 sm:$0xff]   ;;  %v1159_v32 = vld [vmem:[#allocation7 + $0x80] ss:$16 sps:$4 sm:$0xff]  }
  0x59   :  { %1056 = vmatprep.subr.mxu0 %v1389_v0  ;;  %v1160_v34 = vld [vmem:[#allocation7 + $0x88] ss:$16 sps:$4 sm:$0xff]   ;;  %v1163_v35 = vld [vmem:[#allocation7 + $0x64] ss:$16 sps:$4 sm:$0xff]   ;;  %v1168_v36 = vld [vmem:[#allocation7 + $0x6c] ss:$16 sps:$4 sm:$0xff]  }
  0x5a   :  { %1057 = vmatpush3.msra.mxu0 %v134_v6  ;;  %451 = vmatpush1.bf16.msra.mxu1 %v1147_v24  ;;  %v1165_v37 = vld [vmem:[#allocation7 + $0x60] ss:$16 sps:$4 sm:$0xff]   ;;  %v1166_v38 = vld [vmem:[#allocation7 + $0x68] ss:$16 sps:$4 sm:$0xff]   ;;  %v1169_v39 = vld [vmem:[#allocation7 + $0x44] ss:$16 sps:$4 sm:$0xff]   ;;  %v217_v6 = vlaneseq }
  0x5b   :  { %1058 = vmatprep.subr.mxu0 %v1389_v0  ;;  %452 = vmatprep.subr.bf16.mxu1 %v1151_v26  ;;  %v1174_v40 = vld [vmem:[#allocation7 + $0x4c] ss:$16 sps:$4 sm:$0xff]   ;;  %v1171_v41 = vld [vmem:[#allocation7 + $0x40] ss:$16 sps:$4 sm:$0xff]   ;;  %v1172_v42 = vld [vmem:[#allocation7 + $0x48] ss:$16 sps:$4 sm:$0xff]  }
  0x5c   :  { %1059 = vmatpush3.msra.mxu0 %v133_v7  ;;  %v1175_v43 = vld [vmem:[#allocation7 + $0x24] ss:$16 sps:$4 sm:$0xff]   ;;  %v1180_v44 = vld [vmem:[#allocation7 + $0x2c] ss:$16 sps:$4 sm:$0xff]   ;;  %v1177_v45 = vld [vmem:[#allocation7 + $0x20] ss:$16 sps:$4 sm:$0xff]  }
  0x5d   :  { %1060 = vmatprep.subr.mxu0 %v1389_v0  ;;  %v1178_v46 = vld [vmem:[#allocation7 + $0x28] ss:$16 sps:$4 sm:$0xff]   ;;  %v1181_v47 = vld [vmem:[#allocation7 + $0x4] ss:$16 sps:$4 sm:$0xff]   ;;  %v1186_v48 = vld [vmem:[#allocation7 + $0xc] ss:$16 sps:$4 sm:$0xff]  }
  0x5e   :  { %1061 = vmatpush3.msra.mxu0 %v132_v8  ;;  %453 = vmatpush1.bf16.msra.mxu1 %v1153_v28  ;;  %v1183_v49 = vld [vmem:[#allocation7] ss:$16 sps:$4 sm:$0xff]   ;;  %v1184_v50 = vld [vmem:[#allocation7 + $0x8] ss:$16 sps:$4 sm:$0xff]   ;;  %v944_v52 = vld [vmem:[%s1553_s2] ss:$0 sm:$0xff] }
  0x5f   :  { %1062 = vmatprep.subr.mxu0 %v1389_v0  ;;  %454 = vmatprep.subr.bf16.mxu1 %v1157_v30  ;;  %v1187_v57 = vld [vmem:[#allocation8 + $0x70] ss:$8 sps:$4 sm:$0xff]   ;;  %v1189_v58 = vld [vmem:[#allocation8 + $0x74] ss:$8 sps:$4 sm:$0xff]   ;;  %v1192_v59 = vld [vmem:[#allocation8 + $0x64] ss:$8 sps:$4 sm:$0xff]  }
  0x60   :  { %1063 = vmatpush3.msra.mxu0 %v131_v9  ;;  %v1190_v60 = vld [vmem:[#allocation8 + $0x60] ss:$8 sps:$4 sm:$0xff]   ;;  %v1195_v61 = vld [vmem:[#allocation8 + $0x54] ss:$8 sps:$4 sm:$0xff]   ;;  %v1193_v62 = vld [vmem:[#allocation8 + $0x50] ss:$8 sps:$4 sm:$0xff]  }
  0x61   :  { %1064 = vmatprep.subr.mxu0 %v1389_v0  ;;  %v1198_v63 = vld [vmem:[#allocation8 + $0x44] ss:$8 sps:$4 sm:$0xff]   ;;  %v1196_v1 = vld [vmem:[#allocation8 + $0x40] ss:$8 sps:$4 sm:$0xff]   ;;  %v1201_v2 = vld [vmem:[#allocation8 + $0x34] ss:$8 sps:$4 sm:$0xff]  }
  0x62   :  { %1065 = vmatpush3.msra.mxu0 %v130_v10  ;;  %455 = vmatpush1.bf16.msra.mxu1 %v1159_v32  ;;  %v1199_v3 = vld [vmem:[#allocation8 + $0x30] ss:$8 sps:$4 sm:$0xff]   ;;  %v1204_v4 = vld [vmem:[#allocation8 + $0x24] ss:$8 sps:$4 sm:$0xff]   ;;  %v1202_v5 = vld [vmem:[#allocation8 + $0x20] ss:$8 sps:$4 sm:$0xff]  }
  0x63   :  { %1066 = vmatprep.subr.mxu0 %v1389_v0  ;;  %456 = vmatprep.subr.bf16.mxu1 %v1163_v35  ;;  %v1506_v7 = vshrl.u32 %v217_v6, 7  ;;  %v266_v10 = vld [vmem:[%s1555_s4] sm:$0xf]  ;;  %v1210_v30 = vld [vmem:[#allocation8 + $0x4] ss:$8 sps:$4 sm:$0xff]  }
  0x64   :  { %1067 = vmatpush3.msra.mxu0 %v129_v11  ;;  %v1207_v28 = vld [vmem:[#allocation8 + $0x14] ss:$8 sps:$4 sm:$0xff]   ;;  %v1214_v35 = vld [vmem:[#allocation10 + $0x20] sm:$0xff]  }
  0x65   :  { %1068 = vmatprep.subr.mxu0 %v1389_v0  ;;  %v278_v8 = vsub.s32 2, %v1506_v7  ;;  %v282_v9 = vsub.s32 3, %v1506_v7  ;;  %v1211_v32 = vld [vmem:[#allocation10 + $0x38] sm:$0xff]  }
  0x66   :  { %1069 = vmatpush3.msra.mxu0 %v128_v12  ;;  %457 = vmatpush1.bf16.msra.mxu1 %v1165_v37  ;;  %v1216_v37 = vld [vmem:[#allocation10 + $0x10] sm:$0xff]  }
  0x67   :  { %1070 = vmatprep.subr.mxu0 %v1389_v0  ;;  %458 = vmatprep.subr.bf16.mxu1 %v1169_v39  ;;  %v279_v11 = vrot.slane %v266_v10, %v278_v8  ;;  %v274_v39 = vsub.s32 1, %v1506_v7 }
  0x68   :  { %1071 = vmatpush3.msra.mxu0 %v127_v13  ;;  %v283_v13 = vrot.slane %v266_v10, %v282_v9 }
  0x69   :  { %1072 = vmatprep.subr.mxu0 %v1389_v0 }
  0x6a   :  { %1073 = vmatpush3.msra.mxu0 %v126_v14  ;;  %459 = vmatpush1.bf16.msra.mxu1 %v1171_v41  ;;  %v275_v41 = vrot.slane %v266_v10, %v274_v39 }
  0x6b   :  { %1074 = vmatprep.subr.mxu0 %v1389_v0  ;;  %460 = vmatprep.subr.bf16.mxu1 %v1175_v43 }
  0x6c   :  { %1075 = vmatpush3.msra.mxu0 %v125_v15 }
  0x6d   :  { %1076 = vmatprep.subr.mxu0 %v1389_v0 }
  0x6e   :  { %1077 = vmatpush3.msra.mxu0 %v124_v16  ;;  %461 = vmatpush1.bf16.msra.mxu1 %v1177_v45 }
  0x6f   :  { %1079 = vmatmul.mubr.f32.vlgmr.msra.gmra.mxu0 %v1492_v17  ;;  %489 = vmatprep.subr.bf16.mxu0 %v1144_v21 }
  0x70   :  { %490 = vmatpush1.bf16.msra.mxu0 %v1142_v20  ;;  %521 = vmatprep.mubr.bf16.mxu0 %v1391_v33 }
  0x71   :  { %491 = vmatprep.subr.bf16.mxu0 %v1150_v23  ;;  %462 = vmatprep.subr.bf16.mxu1 %v1181_v47  ;;  %v218_v23 = vand.u32 127, %v217_v6 }
  0x72   :  { %463 = vmatpush1.bf16.msra.mxu1 %v1183_v49 }
  0x73   :  { %651 = vmatprep.subr.bf16.mxu1 %v1189_v58  ;;  %v219_v24 = vcvt.s32.f32 %v218_v23  ;;  %v1219_v58 = vld [vmem:[#allocation11 + $0x38] sm:$0xff]  }
  0x74   :  { %492 = vmatpush1.bf16.msra.mxu0 %v1148_v25 }
  0x75   :  { %493 = vmatprep.subr.bf16.mxu0 %v1156_v27  ;;  %481 = vmatmul.mubr.bf16.vlgmr.msra.gmra.mxu1 %v123_v51 }
  0x76   :  { %683 = vmatprep.mubr.bf16.mxu1 %v1391_v33  ;;  %652 = vmatpush1.bf16.msra.mxu1 %v1187_v57  ;;  %v1212_v33 = vld [vmem:[#allocation10 + $0x30] sm:$0xff]   ;;  %v1218_v57 = vld [vmem:[#allocation10] sm:$0xff]  }
  0x77   :  { %653 = vmatprep.subr.bf16.mxu1 %v1192_v59  ;;  %v1220_v59 = vld [vmem:[#allocation11 + $0x30] sm:$0xff]  }
  0x78   :  { %494 = vmatpush1.bf16.msra.mxu0 %v1154_v29  ;;  %v1205_v29 = vld [vmem:[#allocation8 + $0x10] ss:$8 sps:$4 sm:$0xff]  }
  0x79   :  { %495 = vmatprep.subr.bf16.mxu0 %v1162_v31  ;;  %v1208_v31 = vld [vmem:[#allocation8] ss:$8 sps:$4 sm:$0xff]  }
  0x7a   :  { %654 = vmatpush1.bf16.msra.mxu1 %v1190_v60  ;;  %v1221_v60 = vld [vmem:[#allocation11 + $0x28] sm:$0xff]  }
  0x7b   :  { %655 = vmatprep.subr.bf16.mxu1 %v1195_v61  ;;  %v1222_v61 = vld [vmem:[#allocation11 + $0x20] sm:$0xff]  }
  0x7c   :  { %496 = vmatpush1.bf16.msra.mxu0 %v1160_v34  ;;  %v1213_v34 = vld [vmem:[#allocation10 + $0x28] sm:$0xff]  }
  0x7d   :  { %497 = vmatprep.subr.bf16.mxu0 %v1168_v36  ;;  %v1215_v36 = vld [vmem:[#allocation10 + $0x18] sm:$0xff]  }
  0x7e   :  { %656 = vmatpush1.bf16.msra.mxu1 %v1193_v62  ;;  %v1223_v62 = vld [vmem:[#allocation11 + $0x18] sm:$0xff]  }
  0x7f   :  { %657 = vmatprep.subr.bf16.mxu1 %v1198_v63  ;;  %v1224_v63 = vld [vmem:[#allocation11 + $0x10] sm:$0xff]  }
  0x80   :  { %498 = vmatpush1.bf16.msra.mxu0 %v1166_v38  ;;  %v270_v38 = vsub.s32 0, %v1506_v7 }
  0x81   :  { %499 = vmatprep.subr.bf16.mxu0 %v1174_v40 }
  0x82   :  { %658 = vmatpush1.bf16.msra.mxu1 %v1196_v1  ;;  %v271_v40 = vrot.slane %v266_v10, %v270_v38  ;;  %v559_v1 = vld [vmem:[%s1557_s6] sm:$0x3] }
  0x83   :  { %659 = vmatprep.subr.bf16.mxu1 %v1201_v2  ;;  %v564_v2 = vrot.slane %v559_v1, %v270_v38 }
  0x84   :  { %500 = vmatpush1.bf16.msra.mxu0 %v1172_v42 }
  0x85   :  { %501 = vmatprep.subr.bf16.mxu0 %v1180_v44 }
  0x86   :  { %660 = vmatpush1.bf16.msra.mxu1 %v1199_v3 }
  0x87   :  { %661 = vmatprep.subr.bf16.mxu1 %v1204_v4  ;;  %v568_v4 = vrot.slane %v559_v1, %v274_v39 }
  0x88   :  { %502 = vmatpush1.bf16.msra.mxu0 %v1178_v46 }
  0x89   :  { %503 = vmatprep.subr.bf16.mxu0 %v1186_v48 }
  0x8a   :  { %662 = vmatpush1.bf16.msra.mxu1 %v1202_v5 }
  0x8b   :  { %663 = vmatprep.subr.bf16.mxu1 %v1207_v28 }
  0x8c   :  { %504 = vmatpush1.bf16.msra.mxu0 %v1184_v50 }
  0x8d   :  { %1081 = vmatprep.subr.bf16.mxu0 %v1389_v0 }
  0x8e   :  { %664 = vmatpush1.bf16.msra.mxu1 %v1205_v29 }
  0x8f   :  { %522 = vmatmul.mubr.bf16.vlgmr.msra.gmra.mxu0 %v123_v51  ;;  %665 = vmatprep.subr.bf16.mxu1 %v1210_v30 }
  0x90   :  { %1097 = vmatprep.mubr.msk.bf16.mxu0 %vm1390_vm0, %v1389_v0  ;;  %1082 = vmatpush3.bf16.msra.mxu0 %v1211_v32 }
  0x91   :  { %1083 = vmatprep.subr.bf16.mxu0 %v1389_v0 }
  0x92   :  { %666 = vmatpush1.bf16.msra.mxu1 %v1208_v31 }
  0x93   :  { %1101 = vmatprep.subr.bf16.mxu1 %v1389_v0 }
  0x94   :  { %1084 = vmatpush3.bf16.msra.mxu0 %v1212_v33 }
  0x95   :  { %1085 = vmatprep.subr.bf16.mxu0 %v1389_v0 }
  0x98   :  { %1086 = vmatpush3.bf16.msra.mxu0 %v1213_v34 }
  0x99   :  { %1087 = vmatprep.subr.bf16.mxu0 %v1389_v0 }
  0x9c   :  { %1088 = vmatpush3.bf16.msra.mxu0 %v1214_v35 }
  0x9d   :  { %1089 = vmatprep.subr.bf16.mxu0 %v1389_v0 }
  0xa0   :  { %1090 = vmatpush3.bf16.msra.mxu0 %v1215_v36 }
  0xa1   :  { %1091 = vmatprep.subr.bf16.mxu0 %v1389_v0 }
  0xa4   :  { %1092 = vmatpush3.bf16.msra.mxu0 %v1216_v37 }
  0xa5   :  { %1093 = vmatprep.subr.bf16.mxu0 %v1389_v0 }
 0x12f   :  { %v213_v53 = vpop.f32.mrf.mxu0 }
 0x130   :  { %v214_v54 = vadd.f32 %v944_v52, %v213_v53 }
 0x131   :  { %v1080_v55 = vpop.f32.mrf.mxu0 }
 0x132   :  { %v221_v56 = vsel %vm220_vm1, %v214_v54, -inf }
 0x133   :  { %222 = vmax.xlane.f32.xlu0 %v221_v56  ;;  %v1217_v56 = vld [vmem:[#allocation10 + $0x8] sm:$0xff]  }
 0x134   :  { %1094 = vmatpush3.bf16.msra.mxu0 %v1217_v56 }
 0x135   :  { %v482_v12 = vpop.f32.mrf.mxu1  ;;  %1095 = vmatprep.subr.bf16.mxu0 %v1389_v0 }
 0x136   :  { %v483_v42 = vadd.f32 %v482_v12, %v271_v40 }
 0x137   :  { %v484_v15 = vpop.f32.mrf.mxu1 }
 0x138   :  { %v485_v43 = vadd.f32 %v484_v15, %v275_v41  ;;  %v530_v44 = vmax.f32 %v483_v42, 0.0  ;;  %1096 = vmatpush3.bf16.msra.mxu0 %v1218_v57 }
 0x139   :  { %v486_v18 = vpop.f32.mrf.mxu1 }
 0x13a   :  { %v531_v47 = vmax.f32 %v485_v43, 0.0  ;;  %v993_v18 = vld [vmem:[%s1559_s8] ss:$0 sm:$0xff]  ;;  %s1347_s8 = scalar_lea.vmem %s929_s22, 64 }
 0x13b   :  { %v487_v21 = vpop.f32.mrf.mxu1  ;;  %p1348_p2 = scmp.ne.s32.totalorder %s929_s22, %s1347_s8  ;;  %p1353_p4 = scmp.lt.s32.totalorder %s1347_s8, %s1347_s8 }
 0x13d   :  { %p1354_p5 = por %p1353_p4, %p1352_p3 }
 0x13f   :  { %p1355_p6 = pnand %p1354_p5, %p1348_p2 }
 0x14f   :  { %v523_v14 = vpop.f32.mrf.mxu0 }
 0x150   :  { %v1513_v16 = vadd.f32 %v523_v14, %v279_v11 }
 0x151   :  { %v525_v17 = vpop.f32.mrf.mxu0 }
 0x152   :  { %v526_v19 = vadd.f32 %v525_v17, %v283_v13  ;;  %v532_v45 = vmax.f32 %v1513_v16, 0.0  ;;  %v1225_v16 = vld [vmem:[#allocation11 + $0x8] sm:$0xff]   ;;  %v1226_v17 = vld [vmem:[#allocation11] sm:$0xff]  }
 0x153   :  { %v527_v20 = vpop.f32.mrf.mxu0 }
 0x154   :  { %v533_v50 = vmax.f32 %v526_v19, 0.0 }
 0x155   :  { %v528_v22 = vpop.f32.mrf.mxu0 }
 0x1bc   :  { %v223_v25 = vpop.xlane.xlu0 %222 }
 0x1bd   :  { %vm224_vm2 = vcmp.eq.f32.partialorder %v214_v54, %v223_v25 }
 0x1be   :  { %v225_v26 = vsel %vm224_vm2, %v219_v24, 128.0 }
 0x1bf   :  { %v226_v27 = vsel %vm220_vm1, %v225_v26, inf  ;;  %v1002_v26 = vld [vmem:[%s1561_s10] ss:$0 sm:$0xff] }
 0x1c0   :  { %227 = vmin.xlane.f32.xlu0 %v226_v27 }
 0x249   :  { %v228_v46 = vpop.xlane.xlu0 %227 }
 0x24a   :  { %v1121_v48 = vtrunc.f32 %v228_v46  ;;  %vm534_vm3 = vcmp.eq.f32.partialorder %v228_v46, 0.0  ;;  %vm536_vm4 = vcmp.eq.f32.partialorder %v228_v46, 1.0  ;;  %vm538_vm6 = vcmp.eq.f32.partialorder %v228_v46, 2.0 }
 0x24b   :  { %v535_v49 = vsel %vm534_vm3, %v530_v44, 0.0  ;;  %vm540_vm7 = vcmp.eq.f32.partialorder %v228_v46, 3.0  ;;  %v232_v3 = vmul.f32 0.5, %v228_v46 }
 0x24c   :  { %v1122_v51 = vcvt.f32.s32 %v1121_v48  ;;  %v537_v52 = vsel %vm536_vm4, %v531_v47, %v535_v49 }
 0x24d   :  { %v539_v53 = vsel %vm538_vm6, %v532_v45, %v537_v52  ;;  %v233_v7 = vfloor.f32 %v232_v3 }
 0x24e   :  { %231 = vst.msk [vmem:[%s1563_s12] sm:$0xf] %vm230_vm5, %v1122_v51  ;;  %v541_v54 = vsel %vm540_vm7, %v533_v50, %v539_v53 }
 0x24f   :  { %v542_v55 = vpack.c.bf16 %v541_v54, %v541_v54  ;;  %vm694_vm8 = vcmp.eq.f32.partialorder %v233_v7, 0.0 }
 0x251   :  { %684 = vmatmul.mubr.bf16.vlgmr.msra.gmra.mxu1 %v542_v55 }
 0x252   :  { %1117 = vmatprep.mubr.msk.bf16.mxu1 %vm1390_vm0, %v1389_v0  ;;  %1102 = vmatpush3.bf16.msra.mxu1 %v1219_v58 }
 0x253   :  { %1103 = vmatprep.subr.bf16.mxu1 %v1389_v0 }
 0x256   :  { %1104 = vmatpush3.bf16.msra.mxu1 %v1220_v59 }
 0x257   :  { %1105 = vmatprep.subr.bf16.mxu1 %v1389_v0 }
 0x25a   :  { %1106 = vmatpush3.bf16.msra.mxu1 %v1221_v60 }
 0x25b   :  { %1107 = vmatprep.subr.bf16.mxu1 %v1389_v0 }
 0x25e   :  { %1108 = vmatpush3.bf16.msra.mxu1 %v1222_v61 }
 0x25f   :  { %1109 = vmatprep.subr.bf16.mxu1 %v1389_v0 }
 0x262   :  { %1110 = vmatpush3.bf16.msra.mxu1 %v1223_v62 }
 0x263   :  { %1111 = vmatprep.subr.bf16.mxu1 %v1389_v0 }
 0x266   :  { %1112 = vmatpush3.bf16.msra.mxu1 %v1224_v63 }
 0x267   :  { %1113 = vmatprep.subr.bf16.mxu1 %v1389_v0 }
 0x26a   :  { %1114 = vmatpush3.bf16.msra.mxu1 %v1225_v16 }
 0x26b   :  { %1115 = vmatprep.subr.bf16.mxu1 %v1389_v0 }
 0x26e   :  { %1116 = vmatpush3.bf16.msra.mxu1 %v1226_v17 }
 0x311   :  { %v685_v5 = vpop.f32.mrf.mxu1 }
 0x312   :  { %v686_v6 = vadd.f32 %v685_v5, %v564_v2 }
 0x313   :  { %v687_v8 = vpop.f32.mrf.mxu1 }
 0x314   :  { %v688_v9 = vadd.f32 %v687_v8, %v568_v4  ;;  %v692_v11 = vmax.f32 %v686_v6, 0.0 }
 0x315   :  { %v689_v10 = vpop.f32.mrf.mxu1 }
 0x316   :  { %v693_v12 = vmax.f32 %v688_v9, 0.0 }
 0x317   :  { %v690_v13 = vpop.f32.mrf.mxu1 }
 0x318   :  { %v695_v14 = vsel %vm694_vm8, %v692_v11, %v693_v12 }
 0x319   :  { %v696_v15 = vpack.c.bf16 %v695_v14, %v695_v14 }
 0x31b   :  { %1098 = vmatmul.mubr.bf16.vlgmr.msra.gmra.mxu0 %v696_v15 }
 0x3db   :  { %v802_v19 = vpop.f32.mrf.mxu0 }
 0x3dc   :  { %v803_v20 = vadd.f32 %v993_v18, %v802_v19 }
 0x3dd   :  { %v1099_v21 = vpop.f32.mrf.mxu0 }
 0x3de   :  { %v808_v22 = vmax.f32 %v803_v20, 0.0 }
 0x3df   :  { %v805_v23 = vpop.f32.mrf.mxu0 }
 0x3e0   :  { %v809_v24 = vpack.c.bf16 %v808_v22, %v808_v22 }
 0x3e1   :  { %v1100_v25 = vpop.f32.mrf.mxu0 }
 0x3e2   :  { %1118 = vmatmul.mubr.bf16.vlgmr.msra.gmra.mxu1 %v809_v24 }
 0x4a2   :  { %v915_v0 = vpop.f32.mrf.mxu1 }
 0x4a3   :  { %v916_v27 = vadd.f32 %v1002_v26, %v915_v0 }
 0x4a4   :  { %v1119_v28 = vpop.f32.mrf.mxu1 }
 0x4a5   :  { %921 = vst [vmem:[#allocation13] sm:$0xf] %v916_v27 }
 0x4a6   :  { %v918_v29 = vpop.f32.mrf.mxu1 }
 0x4a7   :  { %1358 = shalt.err (!%p1355_p6)
}
 0x4a8   :  { %931 = dma.vmem_to_hbm [thread:$0]  %s929_s22, 64, %s1562_s11, [#allocation4]   ;;  %v1120_v30 = vpop.f32.mrf.mxu1 }
 0x4a9   :  { %1375 = dma.done.wait [#allocation4], 64  }
 0x4aa   :  { %1376 = vsyncadd [#allocation4], 4294967232 }
 0x4ab   :  { %939 = vsyncpa [#allocation3], 1 }
 0x4ac   :  { %940 = vsyncpa [#allocation6], 1 }
 0x4ad   :  { %941 = vsyncpa [#allocation9], 1 }
 0x4ae   :  { %942 = vsyncpa [#allocation12], 1 }
 0x4af   :  { %943 = vsyncpa [#allocation4], 1 }

</bundles_post_ra>
